<compile_context>
chip_gen: v6e
topology: v6e:2x2x1
jax: 0.10.0
libtpu: 0.0.40
codegen_flags: <defaults>
</compile_context>

<pallas_src>
import functools
import math

import jax
import jax.numpy as jnp
from jax.experimental import pallas as pl
from jax.experimental.pallas import tpu as pltpu


def _round_up(v, m):
    return ((v + m - 1) // m) * m


def _tmoe_kernel(x_ref, wf_ref, b_ref, o_ref, *, expert_num, r, scaling):
    # x_ref : [tm, D]          token rows (native dtype, fed straight to MXU)
    # wf_ref: [D, r + E]       fused [compress^T | route^T] weights
    # b_ref : [E*r, out_dim]   routed experts concatenated along K (expert-major)
    # o_ref : [tm, out_dim]
    x = x_ref[...]

    # One fused MXU pass: low-rank compression and router logits together.
    xw = jnp.dot(x, wf_ref[...], preferred_element_type=jnp.float32)   # [tm, r+E] f32
    c = xw[:, :r]                      # [tm, r]  lane offset 0 (hot operand)
    logits = xw[:, r:]                 # [tm, E]  tiny; tolerates the lane shift

    # Softmax over experts (f32 elementwise); fold `scaling` into the routing
    # weights so the O(tm*out) scale multiply disappears.
    m = jnp.max(logits, axis=-1, keepdims=True)
    e = jnp.exp(logits - m)
    s = jnp.sum(e, axis=-1, keepdims=True)
    inv = pl.reciprocal(s, approx=True)          # EUP slot, ~free
    inv = inv * (2.0 - s * inv)                  # one Newton step -> ~exact f32
    w = e * (inv * scaling)                      # [tm, E] f32

    # (w ⊗ c) via a single broadcasted outer product + reshape -> [tm, E*r];
    # all routed experts hit with ONE lane-dense MXU matmul.
    tm = x.shape[0]
    cw = (w[:, :, None] * c[:, None, :]).reshape(tm, expert_num * r)
    out = jnp.dot(cw.astype(b_ref.dtype), b_ref[...],
                  preferred_element_type=jnp.float32)                  # [tm, out]
    o_ref[...] = out.astype(o_ref.dtype)


def _vmem_budget_bytes():
    # ~0.75 x physical VMEM, capped: v7x (64 MiB) -> ~48 MiB, v5e/v6e (128 MiB) -> ~96 MiB.
    try:
        cap = int(pltpu.get_tpu_info().vmem_capacity_bytes)
    except Exception:
        cap = 64 * 2 ** 20   # conservative fallback, safe on every generation
    return int(min(int(0.75 * cap), 100 * 2 ** 20))


def prepare_tmoe_params(route_w, compress_expert, routed_experts, dtype=None):
    """Weight glue, run ONCE at parameter-load time (hoisted out of forward).

    route_w: [E, D]; compress_expert: [r, D]; routed_experts: [E, out_dim, r].
    Returns (wf [D, r+E], b_cat [E*r, out_dim]).
    """
    if dtype is None:
        dtype = compress_expert.dtype
    E, out_dim, r = routed_experts.shape
    # [compress^T | route^T]: compressed activations land at lane offset 0.
    wf = jnp.concatenate(
        [jnp.transpose(compress_expert), jnp.transpose(route_w)], axis=1
    ).astype(dtype)                                                    # [D, r+E]
    b_cat = jnp.transpose(routed_experts, (0, 2, 1)).reshape(E * r, out_dim)
    b_cat = b_cat.astype(dtype)                                        # [E*r, out]
    return wf, b_cat


def tmoe_forward_prepared(x, wf, b_cat, *, expert_num, r, scaling, tile_m=1024):
    """x: [B, N, D]; wf: [D, r+E]; b_cat: [E*r, out_dim] -> [B, N, out_dim]."""
    B, N, D = x.shape
    Er, out_dim = b_cat.shape
    assert Er == expert_num * r

    M = B * N
    x2 = x.reshape(M, D)
    dtype = x.dtype
    itemsize = jnp.dtype(dtype).itemsize
    w_bytes = int((wf.size + b_cat.size) * itemsize)

    if M <= 8:
        tm = M                              # single block equal to the full dim
    else:
        # Keep >= 2 grid steps so ("parallel",) can split across TCs (v7x).
        tm_cap = _round_up(pl.cdiv(M, 2), 8)
        # Per-row VMEM: double-buffered x/out tiles + single-copy f32 intermediates.
        per_row = 2 * (D + out_dim) * itemsize + 4 * (r + expert_num + Er + out_dim)
        avail = _vmem_budget_bytes() - 2 * w_bytes - (4 << 20)   # weights 2x + headroom
        tm_budget = max(8, (avail // per_row) // 8 * 8)
        tm = int(max(8, min(_round_up(tile_m, 8), tm_cap, tm_budget)))

    # Ragged last tile: Pallas masks out-of-bounds stores; garbage input rows
    # only feed row-local math and never contaminate valid rows.
    grid = (pl.cdiv(M, tm),)

    kernel = functools.partial(
        _tmoe_kernel, expert_num=expert_num, r=r, scaling=float(scaling))

    cost = pl.CostEstimate(
        flops=2 * M * (D * (r + expert_num) + Er * out_dim),
        transcendentals=M * expert_num,
        bytes_accessed=int(M * (D + out_dim) * itemsize + w_bytes),
    )

    out2 = pl.pallas_call(
        kernel,
        out_shape=jax.ShapeDtypeStruct((M, out_dim), dtype),
        grid_spec=pltpu.PrefetchScalarGridSpec(
            num_scalar_prefetch=0,
            grid=grid,
            in_specs=[
                pl.BlockSpec((tm, D), lambda i: (i, 0)),              # streamed x tile
                pl.BlockSpec((D, r + expert_num), lambda i: (0, 0)),  # fused weights (resident)
                pl.BlockSpec((Er, out_dim), lambda i: (0, 0)),        # routed experts (resident)
            ],
            out_specs=pl.BlockSpec((tm, out_dim), lambda i: (i, 0)),
        ),
        compiler_params=pltpu.CompilerParams(
            dimension_semantics=("parallel",),
            vmem_limit_bytes=_vmem_budget_bytes()),
        cost_estimate=cost,
    )(x2, wf, b_cat)

    return out2.reshape(B, N, out_dim)


def tmoe_forward(x, route_w, compress_expert, routed_experts, *, alpha,
                 rs_expert=False, tile_m=1024):
    """Convenience wrapper (prefer calling prepare_tmoe_params once offline)."""
    E, out_dim, r = routed_experts.shape
    scaling = alpha / math.sqrt(r) if rs_expert else alpha / r
    wf, b_cat = prepare_tmoe_params(route_w, compress_expert, routed_experts,
                                    dtype=x.dtype)
    return tmoe_forward_prepared(x, wf, b_cat, expert_num=E, r=r,
                                 scaling=scaling, tile_m=tile_m)


def _tmoe_reference(x, route_w, compress_expert, routed_experts, *, alpha, rs_expert=False):
    E, out_dim, r = routed_experts.shape
    scaling = alpha / math.sqrt(r) if rs_expert else alpha / r
    route_weight = jax.nn.softmax(jnp.einsum('bnd,ed->bne', x, route_w), axis=-1)
    c = jnp.einsum('bnd,rd->bnr', x, compress_expert)
    out = 0.0
    for i in range(E):
        up = jnp.einsum('bnr,or->bno', c, routed_experts[i])
        out = out + route_weight[:, :, i:i + 1] * up * scaling
    return out


if __name__ == "__main__":
    # Small, module-consistent shapes: x is [B, N, in_dim].
    B, N = 2, 8
    in_dim, out_dim, r, E = 32, 32, 8, 4
    alpha = 16.0

    key = jax.random.PRNGKey(0)
    kx, kr, ka, kb = jax.random.split(key, 4)

    x = jax.random.normal(kx, (B, N, in_dim), dtype=jnp.float32)

    # Deterministic synthetic parameters (bert init ~ trunc_normal std=0.02;
    # truncation at +/-2 is a no-op at this std, so plain normal suffices).
    route_w = jax.random.normal(kr, (E, in_dim), dtype=jnp.float32) * (1.0 / math.sqrt(in_dim))
    compress_expert = jax.random.normal(ka, (r, in_dim), dtype=jnp.float32) * 0.02
    routed_experts = jax.random.normal(kb, (E, out_dim, r), dtype=jnp.float32) * 0.02

    out = tmoe_forward(x, route_w, compress_expert, routed_experts, alpha=alpha)
    out = jax.block_until_ready(out)

    ref = _tmoe_reference(x, route_w, compress_expert, routed_experts, alpha=alpha)
    assert out.shape == (B, N, out_dim)
    assert jnp.allclose(out, ref, atol=1e-5, rtol=1e-4), "mismatch vs reference"

    print("KERNEL_OK")
</pallas_src>

<mosaic_0001>
module attributes {stable_mosaic.version = 11 : i64} {
  func.func @_tmoe_kernel(%arg0: i32, %arg1: memref<8x32xf32, #tpu.memory_space<vmem>>, %arg2: memref<32x12xf32, #tpu.memory_space<vmem>>, %arg3: memref<32x32xf32, #tpu.memory_space<vmem>>, %arg4: memref<8x32xf32, #tpu.memory_space<vmem>>) attributes {dimension_semantics = [#tpu.dimension_semantics<parallel>], iteration_bounds = array<i64: 2>, scalar_prefetch = 0 : i64, scratch_operands = 0 : i64, tpu.core_type = #tpu.core_type<tc>, window_params = [{transform_indices = @transform_0, window_bounds = array<i64: 8, 32>}, {pipeline_mode = #tpu.pipeline_mode<synchronous>, transform_indices = @transform_1, window_bounds = array<i64: 32, 12>}, {pipeline_mode = #tpu.pipeline_mode<synchronous>, transform_indices = @transform_2, window_bounds = array<i64: 32, 32>}, {transform_indices = @transform_3, window_bounds = array<i64: 8, 32>}]} {
    %c0 = arith.constant 0 : index
    %c0_0 = arith.constant 0 : index
    %0 = vector.load %arg1[%c0, %c0_0] : memref<8x32xf32, #tpu.memory_space<vmem>>, vector<8x32xf32>
    %c0_1 = arith.constant 0 : index
    %c0_2 = arith.constant 0 : index
    %1 = vector.load %arg2[%c0_1, %c0_2] : memref<32x12xf32, #tpu.memory_space<vmem>>, vector<32x12xf32>
    %cst = arith.constant dense<0.000000e+00> : vector<8x12xf32>
    %2 = tpu.matmul %0, %1, %cst {dimension_numbers = #tpu.dot_dimension_numbers<[1], [0], [0], [1], [0, 0, 1, 1], [], []>} : vector<8x32xf32>, vector<32x12xf32>, vector<8x12xf32> -> vector<8x12xf32>
    %3 = vector.extract_strided_slice %2 {offsets = [0, 0], sizes = [8, 8], strides = [1, 1]} : vector<8x12xf32> to vector<8x8xf32>
    %4 = vector.extract_strided_slice %2 {offsets = [0, 8], sizes = [8, 4], strides = [1, 1]} : vector<8x12xf32> to vector<8x4xf32>
    %cst_3 = arith.constant dense<0xFF800000> : vector<8xf32>
    %5 = vector.multi_reduction <maximumf>, %4, %cst_3 [1] : vector<8x4xf32> to vector<8xf32>
    %6 = vector.shape_cast %5 : vector<8xf32> to vector<8x1xf32>
    %7 = vector.broadcast %6 : vector<8x1xf32> to vector<8x4xf32>
    %8 = arith.subf %4, %7 : vector<8x4xf32>
    %9 = math.exp %8 : vector<8x4xf32>
    %cst_4 = arith.constant dense<0.000000e+00> : vector<8xf32>
    %10 = vector.multi_reduction <add>, %9, %cst_4 [1] : vector<8x4xf32> to vector<8xf32>
    %11 = vector.shape_cast %10 : vector<8xf32> to vector<8x1xf32>
    %12 = tpu.reciprocal %11 {approx = true} : vector<8x1xf32> -> vector<8x1xf32>
    %13 = arith.mulf %11, %12 : vector<8x1xf32>
    %cst_5 = arith.constant 2.000000e+00 : f32
    %14 = vector.broadcast %cst_5 : f32 to vector<8x1xf32>
    %15 = arith.subf %14, %13 : vector<8x1xf32>
    %16 = arith.mulf %12, %15 : vector<8x1xf32>
    %cst_6 = arith.constant 2.000000e+00 : f32
    %17 = vector.broadcast %cst_6 : f32 to vector<8x1xf32>
    %18 = arith.mulf %16, %17 : vector<8x1xf32>
    %19 = vector.broadcast %18 : vector<8x1xf32> to vector<8x4xf32>
    %20 = arith.mulf %9, %19 : vector<8x4xf32>
    %21 = vector.shape_cast %20 : vector<8x4xf32> to vector<8x4x1xf32>
    %22 = vector.shape_cast %3 : vector<8x8xf32> to vector<8x1x8xf32>
    %23 = vector.broadcast %21 : vector<8x4x1xf32> to vector<8x4x8xf32>
    %24 = vector.broadcast %22 : vector<8x1x8xf32> to vector<8x4x8xf32>
    %25 = arith.mulf %23, %24 : vector<8x4x8xf32>
    %26 = vector.shape_cast %25 : vector<8x4x8xf32> to vector<8x32xf32>
    %c0_7 = arith.constant 0 : index
    %c0_8 = arith.constant 0 : index
    %27 = vector.load %arg3[%c0_7, %c0_8] : memref<32x32xf32, #tpu.memory_space<vmem>>, vector<32x32xf32>
    %cst_9 = arith.constant dense<0.000000e+00> : vector<8x32xf32>
    %28 = tpu.matmul %26, %27, %cst_9 {dimension_numbers = #tpu.dot_dimension_numbers<[1], [0], [0], [1], [0, 0, 1, 1], [], []>} : vector<8x32xf32>, vector<32x32xf32>, vector<8x32xf32> -> vector<8x32xf32>
    %c0_10 = arith.constant 0 : index
    %c0_11 = arith.constant 0 : index
    %29 = vector.load %arg4[%c0_10, %c0_11] : memref<8x32xf32, #tpu.memory_space<vmem>>, vector<8x32xf32>
    tpu.vector_store %arg4[%c0_10, %c0_11], %28 {strides = array<i32>} : memref<8x32xf32, #tpu.memory_space<vmem>>, vector<8x32xf32>,
    return
  }
  func.func @transform_0(%arg0: i32) -> (i32, i32) {
    %c0_i32 = arith.constant 0 : i32
    %c0_i32_0 = arith.constant 0 : i32
    return %arg0, %c0_i32 : i32, i32
  }
  func.func @transform_1(%arg0: i32) -> (i32, i32) {
    %c0_i32 = arith.constant 0 : i32
    %c0_i32_0 = arith.constant 0 : i32
    %c0_i32_1 = arith.constant 0 : i32
    return %c0_i32, %c0_i32_0 : i32, i32
  }
  func.func @transform_2(%arg0: i32) -> (i32, i32) {
    %c0_i32 = arith.constant 0 : i32
    %c0_i32_0 = arith.constant 0 : i32
    %c0_i32_1 = arith.constant 0 : i32
    return %c0_i32, %c0_i32_0 : i32, i32
  }
  func.func @transform_3(%arg0: i32) -> (i32, i32) {
    %c0_i32 = arith.constant 0 : i32
    %c0_i32_0 = arith.constant 0 : i32
    return %arg0, %c0_i32 : i32, i32
  }
}

</mosaic_0001>

<bundles_post_ra>
// kernel: tpu_custom_call.1
= control target key start
LH: loop header
LB: loop body
LE: loop exit
PB: predicated region body
PF: predicated region fallthrough
CT: control target
= control target key end

     0   :  { %8 = vsyncpa [#allocation3], 0  ;;  %s1013_s0 = inlined_call_operand.vmem [shape: f32[16,32], index: 0, kind: input, shape index: {}]   ;;  %s1014_s1 = inlined_call_operand.vmem [shape: f32[32,12], index: 1, kind: input, shape index: {}]   ;;  %s1015_s2 = inlined_call_operand.vmem [shape: f32[32,32], index: 2, kind: input, shape index: {}]   ;;  %s1016_s3 = inlined_call_operand.hbm [shape: f32[16,32], index: 3, kind: output, shape index: {}]  }
   0x1   :  { %10 = vsyncpa [#allocation3 + $0x1], 0  ;;  %s853_s12 = smov 0   ;;  %s855_s13 = smov 0  }
   0x2   :  { %s857_s14 = smov 0   ;;  %s859_s15 = smov 0  }
   0x3 LB: > { %s874_s16 = sadd.s32 4294967295, %s821_s15   ;;  %s665_s17 = sadd.s32 4294967294, %s821_s15   ;;  %s821_s15 = sphi %s859_s15, %s1022_s15   ;;  %s817_s14 = sphi %s857_s14, %s1021_s14   ;;  %s813_s13 = sphi %s855_s13, %s1020_s13   ;;  %s809_s12 = sphi %s853_s12, %s1019_s12  }
   0x4   : > { %s878_s18 = sadd.s32 1, %s821_s15   ;;  %s91_s19 = sadd.s32 1, %s817_s14 }
   0x5   : > { %s88_s20 = ssub.s32 %s821_s15, %s878_s18  ;;  %p101_p0 = scmp.ne.s32.totalorder %s817_s14, %s813_s13 }
   0x6   : > { %p89_p1 = scmp.eq.s32.totalorder %s88_s20, 0  ;;  %p102_p2 = scmp.eq.s32.totalorder %s874_s16, 1 }
   0x7   : > { %p107_p3 = scmp.ne.s32.totalorder %s813_s13, %s809_s12  ;;  %p108_p4 = scmp.eq.s32.totalorder %s665_s17, 1 }
   0x8   : > { %s889_s21 = scalar_select %p89_p1, %s817_s14, %s91_s19  }
   0x9   : > { %p891_p5 = por %p102_p2, %p101_p0  ;;  %p895_p6 = por %p108_p4, %p107_p3 }
   0xa   : > { %p668_p7 = scmp.ge.s32.totalorder %s821_s15, 1  ;;  %p139_p8 = scmp.lt.s32.totalorder %s821_s15, 3 }
   0xc   : > { %p140_p9 = pnand %p668_p7, %p139_p8 }
   0xd   : > { %p162_p10 = scmp.lt.s32.totalorder (!%p140_p9), %s874_s16, 1  ;;  %s825_s10 = smov (!%p140_p9), 120  }
   0xe   : > { %143 = sbr.rel (%p140_p9) target bundleno = 1128 (0x468), region = 32  ;;  %s830_s29 = smov (!%p140_p9), 8  }
   0xf   : > { %s831_s30 = smov (!%p140_p9), 24   ;;  %s674_s6 = sshll.u32 (!%p140_p9), %s874_s16, 7 }
  0x10   : > { %s971_s11 = scalar_lea.hbm (!%p140_p9), %s1016_s3, %s674_s6 }
  0x13   : > { %v170_v0 = vld [vmem:[%s1014_s1 + $0x18] sm:$0xff]  ;;  %v823_v1 = vmov 0.0   ;;  %v169_v2 = vld [vmem:[%s1014_s1 + $0x10] sm:$0xff]  ;;  %vm824_vm0 = vmmov 0   ;;  %s163_s28 = scalar_select %p162_p10, %s874_s16, 1  ;;  %v168_v3 = vld [vmem:[%s1014_s1 + $0x8] sm:$0xff]  ;;  %v266_v17 = vlaneseq }
  0x14   : > { %687 = vmatprep.subr.mxu0 %v823_v1  ;;  %695 = vmatprep.mubr.msk.f32.mxu0 %vm824_vm0, %v823_v1  ;;  %v167_v4 = vld [vmem:[%s1014_s1] sm:$0xff]  ;;  %vm171_vm1 = vcmask 261120   ;;  %vm245_vm2 = vcmask 97344   ;;  %vm256_vm3 = vcmask 31744   ;;  %v517_v40 = vld [vmem:[%s1015_s2 + $0x18] sm:$0xff]  ;;  %vm508_vm4 = vcmask 64512  }
  0x15   : > { %688 = vmatpush3.msra.mxu0 %v170_v0  ;;  %698 = vmatprep.subr.mxu1 %v823_v1  ;;  %s670_s4 = sshll.u32 %s163_s28, 3  ;;  %v926_v20 = vshrl.u32 %v266_v17, 7  ;;  %v826_v41 = vmov 1966171168   ;;  %v827_v60 = vmov 1983009808  }
  0x16   : > { %689 = vmatprep.subr.mxu0 %v823_v1  ;;  %706 = vmatprep.mubr.msk.f32.mxu1 %vm824_vm0, %v823_v1  ;;  %s165_s9 = scalar_lea.vmem %s1013_s0, %s670_s4  ;;  %v333_v42 = vunpack.c.l.s4 %v826_v41  ;;  %v430_v61 = vunpack.c.l.s4 %v827_v60  ;;  %s829_s28 = smov 16   ;;  %vm510_vm5 = vcmask 130048   ;;  %vm512_vm6 = vcmask 195584  }
  0x17   : > { %690 = vmatpush3.msra.mxu0 %v169_v2  ;;  %v166_v5 = vld [vmem:[%s165_s9] sm:$0xff]  ;;  %v292_v23 = vsub.s32 3, %v926_v20  ;;  %v930_v25 = vsub.s32 0, %v926_v20  ;;  %v308_v28 = vsub.s32 5, %v926_v20  ;;  %v276_v29 = vsub.s32 1, %v926_v20  ;;  %699 = vmatpush3.msra.mxu1 %v517_v40  ;;  %s159_s4 = sand.u32 1, %s813_s13  }
  0x18   : > { %691 = vmatprep.subr.mxu0 %v823_v1  ;;  %v324_v32 = vsub.s32 7, %v926_v20  ;;  %v284_v33 = vsub.s32 2, %v926_v20  ;;  %v300_v36 = vsub.s32 4, %v926_v20  ;;  %v316_v38 = vsub.s32 6, %v926_v20  ;;  %700 = vmatprep.subr.mxu1 %v823_v1  ;;  %s669_s5 = sshll.u32 %s159_s4, 3  ;;  %s593_s17 = scalar_lea.sflag [#allocation3], %s159_s4 }
  0x19   : > { %692 = vmatpush3.msra.mxu0 %v168_v3  ;;  %v334_v43 = vunpack.c.0.s8 %v333_v42  ;;  %s161_s7 = scalar_lea.vmem [#allocation2], %s669_s5  ;;  %s832_s16 = smov [#allocation2]  }
  0x1a   : > { %693 = vmatprep.subr.mxu0 %v823_v1  ;;  %s606_s8 = sshll.u32 %s161_s7, 4  ;;  %s765_s20 = sshll.u32 %s832_s16, 4  ;;  %s973_s8 = int_to_ptr.vmem [resolvable:$true] %s606_s8  ;;  %s766_s20 = int_to_ptr.vmem [resolvable:$false] %s765_s20 }
  0x1b   : > { %694 = vmatpush3.msra.mxu0 %v167_v4  ;;  %v337_v44 = vsub.s32 %v334_v43, %v926_v20  ;;  %s761_s19 = scalar_lea.vmem %s973_s8, 128  ;;  %s767_s24 = scalar_lea.vmem %s766_s20, 256 }
  0x1c   : > { %696 = vmatmul.mubr.msk.f32.vlgmr.msra.gmra.mxu0 %vm171_vm1, %v166_v5  ;;  %p762_p11 = scmp.ne.s32.totalorder %s973_s8, %s761_s19  ;;  %p768_p0 = scmp.lt.s32.totalorder %s973_s8, %s766_s20 }
  0x1d   : > { %p769_p1 = scmp.lt.s32.totalorder %s767_s24, %s761_s19 }
  0x1e   : > { %p763_p12 = pnand %p762_p11, %p891_p5 }
  0x1f   : > { %p770_p2 = por %p769_p1, %p768_p0 }
  0x20   : > { %p764_p13 = pneg %p763_p12 }
  0x22   : > { %p771_p3 = pnand %p770_p2, %p764_p13 }
  0xdc   : > { %v241_v6 = vpop.f32.mrf.mxu0 }
  0xdd   : > { %v246_v7 = vsel %vm245_vm2, %v241_v6, -inf  ;;  %v331_v45 = vcombine.high %v241_v6, %v241_v6  ;;  %v338_v46 = vrot.slane %v241_v6, %v337_v44 }
  0xde   : > { %247 = vmax.xlane.f32.xlu0 %v246_v7  ;;  %v697_v8 = vpop.f32.mrf.mxu0 }
  0xdf   : > { %v345_v47 = vrot.slane %v331_v45, %v337_v44  ;;  %v346_v48 = vcombine.high %v338_v46, %v338_v46  ;;  %v354_v49 = vrot.slane %v338_v46, %v337_v44 }
  0xe1   : > { %v347_v50 = vcombine.high %v345_v47, %v345_v47  ;;  %v368_v53 = vrot.slane %v346_v48, %v337_v44  ;;  %v376_v55 = vcombine.high %v354_v49, %v354_v49  ;;  %v361_v59 = vrot.slane %v345_v47, %v337_v44 }
  0xe2   : > { %v383_v2 = vrot.slane %v354_v49, %v930_v25 }
  0xe3   : > { %v375_v54 = vrot.slane %v347_v50, %v337_v44  ;;  %v378_v58 = vcombine.high %v368_v53, %v368_v53  ;;  %v391_v63 = vrot.slane %v376_v55, %v930_v25  ;;  %v387_v3 = vrot.slane %v368_v53, %v930_v25 }
  0xe4   : > { %v377_v7 = vcombine.high %v361_v59, %v361_v59 }
  0xe5   : > { %v379_v62 = vcombine.high %v375_v54, %v375_v54  ;;  %v395_v5 = vrot.slane %v378_v58, %v930_v25 }
 0x167   : > { %v248_v9 = vpop.xlane.xlu0 %247 }
 0x168   : > { %v249_v10 = vsub.f32 %v241_v6, %v248_v9  ;;  %v431_v9 = vunpack.c.0.s8 %v430_v61 }
 0x16a   : > { %v250_v11 = vmul.f32 1.442695, %v249_v10 }
 0x16c   : > { %757 = vpow2.f32 %v250_v11  ;;  %v411_v11 = vrot.slane %v379_v62, %v930_v25 }
 0x179   : > { %v758_v12 = vpop.eup %757 }
 0x17a   : > { %253 = vrot.lane.b32.xlu0 %v758_v12, %s825_s10 }
 0x1ec   : > { %v254_v13 = vpop.permute.xlu0 %253 }
 0x1ed   : > { %v257_v14 = vsel %vm256_vm3, %v254_v13, 0.0  ;;  %v828_v13 = vmov 1934713408  }
 0x1ee   : > { %258 = vadd.xlane.f32.xlu1 %v257_v14  ;;  %v463_v14 = vunpack.c.l.s4 %v828_v13 }
 0x277   : > { %v259_v15 = vpop.xlane.xlu1 %258 }
 0x278   : > { %759 = vrcp.f32 %v259_v15 }
 0x285   : > { %v760_v16 = vpop.eup %759 }
 0x286   : > { %v261_v18 = vmul.f32 %v760_v16, %v259_v15 }
 0x288   : > { %v262_v19 = vsub.f32 2.0, %v261_v18 }
 0x28a   : > { %v263_v21 = vmul.f32 %v760_v16, %v262_v19  ;;  %v403_v16 = vrot.slane %v375_v54, %v930_v25  ;;  %v399_v19 = vrot.slane %v361_v59, %v930_v25 }
 0x28c   : > { %v264_v22 = vmul.f32 2.0, %v263_v21 }
 0x28e   : > { %v265_v24 = vmul.f32 %v758_v12, %v264_v22  ;;  %v434_v22 = vsub.s32 %v431_v9, %v926_v20 }
 0x290   : > { %v293_v26 = vrot.slane %v265_v24, %v292_v23  ;;  %v269_v27 = vrot.slane %v265_v24, %v930_v25  ;;  %v309_v30 = vrot.slane %v265_v24, %v308_v28  ;;  %v277_v31 = vrot.slane %v265_v24, %v276_v29  ;;  %v516_v28 = vld [vmem:[%s1015_s2 + $0x10] sm:$0xff]  ;;  %v515_v29 = vld [vmem:[%s1015_s2 + $0x8] sm:$0xff] }
 0x291   : > { %v325_v34 = vrot.slane %v265_v24, %v324_v32  ;;  %v285_v35 = vrot.slane %v265_v24, %v284_v33  ;;  %v301_v37 = vrot.slane %v265_v24, %v300_v36  ;;  %v317_v39 = vrot.slane %v265_v24, %v316_v38  ;;  %701 = vmatpush3.msra.mxu1 %v516_v28  ;;  %v514_v36 = vld [vmem:[%s1015_s2] sm:$0xff] }
 0x292   : > { %296 = vbcast.lane.b32.xlu0 %v293_v26, 264  ;;  %272 = vbcast.lane.b32.xlu1 %v269_v27, 264  ;;  %v407_v24 = vrot.slane %v377_v7, %v930_v25  ;;  %v464_v27 = vunpack.c.0.s8 %v463_v14 }
 0x293   : > { %702 = vmatprep.subr.mxu1 %v823_v1 }
 0x294   : > { %703 = vmatpush3.msra.mxu1 %v515_v29  ;;  %v467_v25 = vsub.s32 %v464_v27, %v926_v20 }
 0x295   : > { %704 = vmatprep.subr.mxu1 %v823_v1 }
 0x296   : > { %312 = vbcast.lane.b32.xlu0 %v309_v30, 264  ;;  %280 = vbcast.lane.b32.xlu1 %v277_v31, 264 }
 0x297   : > { %705 = vmatpush3.msra.mxu1 %v514_v36 }
 0x29a   : > { %328 = vbcast.lane.b32.xlu0 %v325_v34, 264  ;;  %288 = vbcast.lane.b32.xlu1 %v285_v35, 264 }
 0x29e   : > { %304 = vbcast.lane.b32.xlu1 %v301_v37, 264 }
 0x2a2   : > { %320 = vbcast.lane.b32.xlu1 %v317_v39, 264 }
 0x304   : > { %v297_v51 = vpop.permute.xlu0 %296  ;;  %v273_v52 = vpop.permute.xlu1 %272 }
 0x305   : > { %v420_v8 = vmul.f32 %v383_v2, %v273_v52  ;;  %v423_v15 = vmul.f32 %v395_v5, %v297_v51 }
 0x308   : > { %v313_v56 = vpop.permute.xlu0 %312  ;;  %v281_v57 = vpop.permute.xlu1 %280 }
 0x309   : > { %v421_v10 = vmul.f32 %v387_v3, %v281_v57  ;;  %v425_v21 = vmul.f32 %v403_v16, %v313_v56 }
 0x30b   : > { %v436_v23 = vcombine.low %v421_v10, %v423_v15 }
 0x30c   : > { %v289_v0 = vpop.permute.xlu1 %288  ;;  %v329_v6 = vpop.permute.xlu0 %328 }
 0x30d   : > { %v422_v4 = vmul.f32 %v391_v63, %v289_v0  ;;  %v427_v17 = vmul.f32 %v411_v11, %v329_v6  ;;  %v443_v34 = vrot.slane %v436_v23, %v434_v22 }
 0x30f   : > { %v428_v18 = vcombine.low %v420_v8, %v422_v4  ;;  %v452_v30 = vcombine.low %v425_v21, %v427_v17 }
 0x310   : > { %v305_v12 = vpop.permute.xlu1 %304 }
 0x311   : > { %v435_v31 = vrot.slane %v428_v18, %v434_v22  ;;  %v424_v32 = vmul.f32 %v399_v19, %v305_v12  ;;  %v459_v37 = vrot.slane %v452_v30, %v434_v22 }
 0x313   : > { %v460_v38 = vcombine.low %v435_v31, %v443_v34  ;;  %v461_v39 = vcombine.high %v435_v31, %v443_v34 }
 0x314   : > { %v321_v26 = vpop.permute.xlu1 %320 }
 0x315   : > { %v426_v33 = vmul.f32 %v407_v24, %v321_v26  ;;  %v475_v43 = vrot.slane %v461_v39, %v467_v25  ;;  %v468_v45 = vrot.slane %v460_v38, %v467_v25 }
 0x317   : > { %v444_v35 = vcombine.low %v424_v32, %v426_v33 }
 0x319   : > { %v451_v40 = vrot.slane %v444_v35, %v434_v22 }
 0x31b   : > { %v476_v41 = vcombine.low %v451_v40, %v459_v37  ;;  %v477_v42 = vcombine.high %v451_v40, %v459_v37 }
 0x31d   : > { %v491_v44 = vrot.slane %v477_v42, %v467_v25  ;;  %v484_v46 = vrot.slane %v476_v41, %v467_v25 }
 0x31f   : > { %v494_v47 = vcombine.low %v475_v43, %v491_v44  ;;  %v493_v48 = vcombine.high %v468_v45, %v484_v46  ;;  %v492_v20 = vcombine.low %v468_v45, %v484_v46  ;;  %v495_v1 = vcombine.high %v475_v43, %v491_v44 }
 0x321   : > { %501 = vrot.lane.b32.xlu0 %v494_v47, %s829_s28  ;;  %497 = vrot.lane.b32.xlu1 %v493_v48, %s830_s29 }
 0x325   : > { %505 = vrot.lane.b32.xlu1 %v495_v1, %s831_s30 }
 0x393   : > { %v498_v49 = vpop.permute.xlu1 %497  ;;  %v502_v50 = vpop.permute.xlu0 %501 }
 0x394   : > { %v509_v51 = vsel %vm508_vm4, %v492_v20, %v498_v49 }
 0x395   : > { %v511_v53 = vsel %vm510_vm5, %v509_v51, %v502_v50 }
 0x397   : > { %v506_v52 = vpop.permute.xlu1 %505 }
 0x398   : > { %v513_v54 = vsel %vm512_vm6, %v511_v53, %v506_v52 }
 0x399   : > { %707 = vmatmul.mubr.msk.f32.vlgmr.msra.gmra.mxu1 %vm171_vm1, %v513_v54 }
 0x459   : > { %v587_v55 = vpop.f32.mrf.mxu1 }
 0x45a   : > { %591 = vst.msk [vmem:[%s161_s7] sm:$0xff] %vm171_vm1, %v587_v55 }
 0x45b   : > { %v708_v56 = vpop.f32.mrf.mxu1 }
 0x45c   : > { %774 = shalt.err (!%p771_p3)
}
 0x45d   : > { %s775_s25 = scalar_lea.hbm %s971_s11, 128  ;;  %s779_s28 = scalar_lea.hbm %s1016_s3, 256 }
 0x45e   : > { %p776_p4 = scmp.ne.s32.totalorder %s971_s11, %s775_s25  ;;  %p780_p9 = scmp.lt.s32.totalorder %s971_s11, %s1016_s3 }
 0x45f   : > { %p781_p10 = scmp.lt.s32.totalorder %s779_s28, %s775_s25 }
 0x460   : > { %p777_p7 = pnand %p776_p4, %p891_p5 }
 0x461   : > { %p782_p11 = por %p781_p10, %p780_p9 }
 0x462   : > { %p778_p8 = pneg %p777_p7 }
 0x464   : > { %p783_p12 = pnand %p782_p11, %p778_p8 }
 0x466   : > { %786 = shalt.err (!%p783_p12)
}
 0x467   : > { %709 = dma.vmem_to_hbm [thread:$0]  (%p891_p5), %s973_s8, 128, %s971_s11, %s593_s17  }
 0x468 PF: > { %p715_p13 = scmp.ge.s32.totalorder %s821_s15, 2  ;;  %s618_s4 = sand.u32 1, %s809_s12  }
 0x469   : > { %s619_s5 = scalar_lea.sflag [#allocation3], %s618_s4 }
 0x46a   : > { %p712_p0 = pnand %p715_p13, %p895_p6 }
 0x46c   : > { %p713_p1 = pneg %p712_p0 }
 0x46e   : > { %804 = dma.done.wait (%p713_p1), %s619_s5, 128  }
 0x46f   : > { %806 = vsyncadd (%p713_p1), %s619_s5, 4294967168  ;;  %p13_p2 = scmp.ge.s32.totalorder %s878_s18, 4   ;;  %s1019_s12 = smov %s813_s13 }
 0x470   : > { %s1020_s13 = smov %s817_s14  ;;  %s1021_s14 = smov %s889_s21 }
 0x471   : > { %s1022_s15 = smov %s878_s18  ;;  %15 = sbr.rel (!%p13_p2) target bundleno = 3 (0x3), region = 67 }
 0x476   :  { %624 = vsyncpa [#allocation3], 1 }
 0x477   :  { %626 = vsyncpa [#allocation3 + $0x1], 1 }

</bundles_post_ra>
